<compile_context>
chip_gen: v5e
topology: v5e:2x2
jax: 0.10.0
libtpu: 0.0.40
codegen_flags: <defaults>
</compile_context>

<pallas_src>
import functools

import numpy as np
import jax
import jax.numpy as jnp
from jax import lax
from jax.experimental import pallas as pl
from jax.experimental.pallas import tpu as pltpu

DEGREE = 5  # args.degree (static representative default)


# TODO(synk): `legendre_torch` itself is not included in the spec; it is
# implemented here as the standard least-squares Legendre-coefficient fit
# (rtn_data=False -> coefficients). Any linear legendre_torch keeps the fused
# difference kernel below exact.
def _legendre_basis(length: int, degree: int) -> np.ndarray:
    """P[i, k] = P_k(x_i), x = linspace(-1, 1, length), float64 (host const)."""
    x = np.linspace(-1.0, 1.0, length, dtype=np.float64)
    P = np.zeros((length, degree + 1), dtype=np.float64)
    P[:, 0] = 1.0
    if degree >= 1:
        P[:, 1] = x
    for k in range(1, degree):
        P[:, k + 1] = ((2 * k + 1) * x * P[:, k] - k * P[:, k - 1]) / (k + 1)
    return P


def _legendre_projection_matrix(length: int, degree: int) -> np.ndarray:
    """W such that the least-squares Legendre coeffs of a row y are y @ W."""
    P = _legendre_basis(length, degree)      # [L, C]
    G = P.T @ P                              # [C, C], well conditioned
    return np.linalg.solve(G, P.T).T         # [L, C]  == pinv(P).T


def _legendre_loss_kernel(pred_ref, targ_ref, w_ref, out_ref, acc_ref, *, inv_n):
    i = pl.program_id(0)

    @pl.when(i == 0)
    def _():
        acc_ref[...] = jnp.zeros_like(acc_ref)

    diff = pred_ref[...].astype(jnp.float32) - targ_ref[...].astype(jnp.float32)
    # Fused Legendre-coefficient matmul on the difference (MXU).
    coeff = jnp.dot(
        diff,
        w_ref[...],
        precision=lax.Precision.HIGHEST,
        preferred_element_type=jnp.float32,
    )
    acc_ref[...] += jnp.abs(coeff)

    @pl.when(i == pl.num_programs(0) - 1)
    def _():
        out_ref[0] = jnp.sum(acc_ref[...]) * jnp.float32(inv_n)


def _round_up8(n: int) -> int:
    return ((n + 7) // 8) * 8


def _pick_batch_tile(batch: int, length: int) -> int:
    # Memory-bound kernel: make the batch tile as big as the pipeline-buffer
    # budget allows (2 inputs x 2 pipeline buffers, f32) so per-step overhead
    # is amortized and DMAs stay near the HBM roofline.  Budget ~24 MiB keeps
    # us comfortably inside scoped VMEM on v5e/v6e/v7x.
    budget = 24 * 1024 * 1024
    per_row = 2 * 2 * length * 4
    cap = max(8, (budget // per_row) // 8 * 8)
    tb_max = int(min(cap, 8192))
    if batch <= tb_max:
        return max(8, _round_up8(batch))
    # Balance block sizes so padding never exceeds ~8 rows per block.
    n_blocks = -(-batch // tb_max)               # cdiv
    return max(8, _round_up8(-(-batch // n_blocks)))


@functools.partial(jax.jit, static_argnames=("degree", "batch_tile"))
def legendre_loss(predictions, targets, degree: int = DEGREE, batch_tile=None):
    """mean(|legendre_coeffs(pred) - legendre_coeffs(targ)|) via one Pallas kernel."""
    B, L = predictions.shape
    C = degree + 1
    W = jnp.asarray(_legendre_projection_matrix(L, degree), dtype=jnp.float32)

    TB = int(batch_tile) if batch_tile is not None else _pick_batch_tile(B, L)
    Bp = ((B + TB - 1) // TB) * TB
    if Bp != B:
        # Exact: padded rows give pred - targ == 0 -> zero coefficients.
        pad = ((0, Bp - B), (0, 0))
        predictions = jnp.pad(predictions, pad)
        targets = jnp.pad(targets, pad)
    num_blocks = Bp // TB

    kernel = functools.partial(_legendre_loss_kernel, inv_n=1.0 / (B * C))

    vmem_need = 2 * 2 * TB * L * 4 + 2 * L * C * 4 + TB * C * 4
    vmem_limit = int(min(max(vmem_need + (8 << 20), 16 << 20), 60 << 20))

    out = pl.pallas_call(
        kernel,
        out_shape=jax.ShapeDtypeStruct((1,), jnp.float32),
        grid_spec=pltpu.PrefetchScalarGridSpec(
            num_scalar_prefetch=0,
            grid=(num_blocks,),
            in_specs=[
                pl.BlockSpec((TB, L), lambda i: (i, 0)),
                pl.BlockSpec((TB, L), lambda i: (i, 0)),
                pl.BlockSpec((L, C), lambda i: (0, 0)),  # constant, stays resident
            ],
            out_specs=pl.BlockSpec(memory_space=pltpu.SMEM),
            scratch_shapes=[pltpu.VMEM((TB, C), jnp.float32)],
        ),
        compiler_params=pltpu.CompilerParams(
            dimension_semantics=("arbitrary",),  # batch axis carries the accumulator
            vmem_limit_bytes=vmem_limit,
        ),
        cost_estimate=pl.CostEstimate(
            flops=2 * Bp * L * C,
            transcendentals=0,
            bytes_accessed=2 * Bp * L * 4 + L * C * 4 + 4,
        ),
    )(predictions, targets, W)
    return out[0]


def _reference(predictions, targets, degree: int = DEGREE) -> float:
    """Host float64 reference mirroring the PyTorch forward (two separate fits)."""
    pred = np.asarray(jax.device_get(predictions), dtype=np.float64)
    targ = np.asarray(jax.device_get(targets), dtype=np.float64)
    W = _legendre_projection_matrix(pred.shape[-1], degree)   # float64
    pred_leg = pred @ W
    targ_leg = targ @ W
    return float(np.mean(np.abs(pred_leg - targ_leg)))


if __name__ == "__main__":
    key = jax.random.PRNGKey(0)
    k1, k2, k3, k4 = jax.random.split(key, 4)

    # Main small case (single block).
    B, L = 8, 128
    predictions = jax.random.normal(k1, (B, L), dtype=jnp.float32)
    targets = jax.random.normal(k2, (B, L), dtype=jnp.float32)
    out = legendre_loss(predictions, targets)
    jax.block_until_ready(out)
    ref = _reference(predictions, targets)
    assert np.allclose(float(out), ref, rtol=1e-4, atol=1e-5), (float(out), ref)

    # Multi-block + batch-padding path (exercises accumulator init/finalize).
    B2, L2 = 40, 96
    p2 = jax.random.normal(k3, (B2, L2), dtype=jnp.float32)
    t2 = jax.random.normal(k4, (B2, L2), dtype=jnp.float32)
    out2 = legendre_loss(p2, t2, batch_tile=16)
    jax.block_until_ready(out2)
    ref2 = _reference(p2, t2)
    assert np.allclose(float(out2), ref2, rtol=1e-4, atol=1e-5), (float(out2), ref2)

    print("KERNEL_OK")
</pallas_src>

<mosaic_0001>
module attributes {stable_mosaic.version = 11 : i64} {
  func.func @_legendre_loss_kernel(%arg0: i32, %arg1: memref<8x128xf32, #tpu.memory_space<vmem>>, %arg2: memref<8x128xf32, #tpu.memory_space<vmem>>, %arg3: memref<128x6xf32, #tpu.memory_space<vmem>>, %arg4: memref<1xf32, #tpu.memory_space<smem>>, %arg5: memref<8x6xf32, #tpu.memory_space<vmem>>) attributes {dimension_semantics = [#tpu.dimension_semantics<arbitrary>], iteration_bounds = array<i64: 1>, scalar_prefetch = 0 : i64, scratch_operands = 1 : i64, tpu.core_type = #tpu.core_type<tc>, window_params = [{transform_indices = @transform_0, window_bounds = array<i64: 8, 128>}, {transform_indices = @transform_1, window_bounds = array<i64: 8, 128>}, {pipeline_mode = #tpu.pipeline_mode<synchronous>, transform_indices = @transform_2, window_bounds = array<i64: 128, 6>}, {transform_indices = @transform_3, window_bounds = array<i64: 1>}]} {
    %c0_i32 = arith.constant 0 : i32
    %0 = arith.cmpi eq, %arg0, %c0_i32 : i32
    %1 = arith.extui %0 : i1 to i32
    %c0_i32_0 = arith.constant 0 : i32
    %2 = arith.cmpi ne, %1, %c0_i32_0 : i32
    scf.if %2 {
      %cst_12 = arith.constant 0.000000e+00 : f32
      %15 = vector.broadcast %cst_12 : f32 to vector<8x6xf32>
      %c0_13 = arith.constant 0 : index
      %c0_14 = arith.constant 0 : index
      %16 = vector.load %arg5[%c0_13, %c0_14] : memref<8x6xf32, #tpu.memory_space<vmem>>, vector<8x6xf32>
      tpu.vector_store %arg5[%c0_13, %c0_14], %15 {strides = array<i32>} : memref<8x6xf32, #tpu.memory_space<vmem>>, vector<8x6xf32>,
    } else {
    }
    %c0 = arith.constant 0 : index
    %c0_1 = arith.constant 0 : index
    %3 = vector.load %arg1[%c0, %c0_1] : memref<8x128xf32, #tpu.memory_space<vmem>>, vector<8x128xf32>
    %c0_2 = arith.constant 0 : index
    %c0_3 = arith.constant 0 : index
    %4 = vector.load %arg2[%c0_2, %c0_3] : memref<8x128xf32, #tpu.memory_space<vmem>>, vector<8x128xf32>
    %5 = arith.subf %3, %4 : vector<8x128xf32>
    %c0_4 = arith.constant 0 : index
    %c0_5 = arith.constant 0 : index
    %6 = vector.load %arg3[%c0_4, %c0_5] : memref<128x6xf32, #tpu.memory_space<vmem>>, vector<128x6xf32>
    %cst = arith.constant dense<0.000000e+00> : vector<8x6xf32>
    %7 = tpu.matmul %5, %6, %cst {dimension_numbers = #tpu.dot_dimension_numbers<[1], [0], [0], [1], [0, 0, 1, 1], [], []>, precision = #tpu.contract_precision<fp32>} : vector<8x128xf32>, vector<128x6xf32>, vector<8x6xf32> -> vector<8x6xf32>
    %c0_6 = arith.constant 0 : index
    %c0_7 = arith.constant 0 : index
    %8 = vector.load %arg5[%c0_6, %c0_7] : memref<8x6xf32, #tpu.memory_space<vmem>>, vector<8x6xf32>
    %9 = math.absf %7 : vector<8x6xf32>
    %10 = arith.addf %8, %9 : vector<8x6xf32>
    %c0_8 = arith.constant 0 : index
    %c0_9 = arith.constant 0 : index
    %11 = vector.load %arg5[%c0_8, %c0_9] : memref<8x6xf32, #tpu.memory_space<vmem>>, vector<8x6xf32>
    tpu.vector_store %arg5[%c0_8, %c0_9], %10 {strides = array<i32>} : memref<8x6xf32, #tpu.memory_space<vmem>>, vector<8x6xf32>,
    %c0_i32_10 = arith.constant 0 : i32
    %12 = arith.cmpi eq, %arg0, %c0_i32_10 : i32
    %13 = arith.extui %12 : i1 to i32
    %c0_i32_11 = arith.constant 0 : i32
    %14 = arith.cmpi ne, %13, %c0_i32_11 : i32
    scf.if %14 {
      %c0_12 = arith.constant 0 : index
      %c0_13 = arith.constant 0 : index
      %15 = vector.load %arg5[%c0_12, %c0_13] : memref<8x6xf32, #tpu.memory_space<vmem>>, vector<8x6xf32>
      %16 = vector.shape_cast %15 : vector<8x6xf32> to vector<1x8x6xf32>
      %cst_14 = arith.constant dense<0.000000e+00> : vector<1xf32>
      %17 = vector.multi_reduction <add>, %16, %cst_14 [1, 2] : vector<1x8x6xf32> to vector<1xf32>
      %18 = vector.shape_cast %17 : vector<1xf32> to vector<1x1x1xf32>
      %19 = vector.extract %18[0, 0, 0] : f32 from vector<1x1x1xf32>
      %cst_15 = arith.constant 0.020833334 : f32
      %20 = arith.mulf %19, %cst_15 : f32
      %c0_16 = arith.constant 0 : index
      %21 = memref.load %arg4[%c0_16] : memref<1xf32, #tpu.memory_space<smem>>
      memref.store %20, %arg4[%c0_16] : memref<1xf32, #tpu.memory_space<smem>>
    } else {
    }
    return
  }
  func.func @transform_0(%arg0: i32) -> (i32, i32) {
    %c0_i32 = arith.constant 0 : i32
    %c0_i32_0 = arith.constant 0 : i32
    return %arg0, %c0_i32 : i32, i32
  }
  func.func @transform_1(%arg0: i32) -> (i32, i32) {
    %c0_i32 = arith.constant 0 : i32
    %c0_i32_0 = arith.constant 0 : i32
    return %arg0, %c0_i32 : i32, i32
  }
  func.func @transform_2(%arg0: i32) -> (i32, i32) {
    %c0_i32 = arith.constant 0 : i32
    %c0_i32_0 = arith.constant 0 : i32
    %c0_i32_1 = arith.constant 0 : i32
    return %c0_i32, %c0_i32_0 : i32, i32
  }
  func.func @transform_3(%arg0: i32) -> i32 {
    %c0_i32 = arith.constant 0 : i32
    %c0_i32_0 = arith.constant 0 : i32
    return %c0_i32 : i32
  }
}

</mosaic_0001>

<bundles_post_ra>
// kernel: legendre_loss.1
= control target key start
LH: loop header
LB: loop body
LE: loop exit
PB: predicated region body
PF: predicated region fallthrough
CT: control target
= control target key end

     0   :  { %8 = vsyncpa [#allocation4], 0  ;;  %s842_s0 = inlined_call_operand.hbm [shape: f32[8,128], index: 0, kind: input, shape index: {}]   ;;  %s843_s1 = inlined_call_operand.hbm [shape: f32[8,128], index: 1, kind: input, shape index: {}]   ;;  %s844_s2 = inlined_call_operand.hbm [shape: f32[128,6], index: 2, kind: input, shape index: {}]   ;;  %s845_s3 = inlined_call_operand.hbm [shape: f32[1], index: 3, kind: output, shape index: {}]  }
   0x1   :  { %9 = vsyncpa [#allocation7], 0  ;;  %s27_s14 = sshll.u32 %s843_s1, 4  ;;  %s28_s14 = int_to_ptr.hbm [resolvable:$true] %s27_s14 }
   0x2   :  { %10 = vsyncpa [#allocation5], 0  ;;  %s562_s15 = smov [#allocation6]   ;;  %s16_s19 = sshll.u32 %s842_s0, 4  ;;  %s17_s19 = int_to_ptr.hbm [resolvable:$true] %s16_s19 }
   0x3   :  { %s29_s16 = sshll.u32 %s562_s15, 4  ;;  %s563_s20 = smov [#allocation3]   ;;  %s30_s16 = int_to_ptr.vmem [resolvable:$true] %s29_s16 }
   0x4   :  { %32 = dma.hbm_to_vmem [thread:$0]  %s28_s14, 128, %s30_s16, [#allocation7]  }
   0x5   :  { %s18_s21 = sshll.u32 %s563_s20, 4  ;;  %s37_s24 = sshll.u32 %s844_s2, 4  ;;  %s19_s21 = int_to_ptr.vmem [resolvable:$true] %s18_s21  ;;  %s38_s24 = int_to_ptr.hbm [resolvable:$true] %s37_s24 }
   0x6   :  { %21 = dma.hbm_to_vmem [thread:$0]  %s17_s19, 128, %s19_s21, [#allocation4]  }
   0x7   :  { %s564_s1 = smov [#allocation8]   ;;  %s565_s26 = smov 128  }
   0x8   :  { %s39_s25 = sshll.u32 %s564_s1, 4  ;;  %s566_s27 = smov 8   ;;  %s40_s25 = int_to_ptr.vmem [resolvable:$true] %s39_s25 }
   0x9   :  { %45 = dma.hbm_to_vmem [thread:$0]  %s38_s24, 2048, %s40_s25, [#allocation7], %s565_s26, %s565_s26, %s566_s27  }
   0xa   :  { %556 = dma.done.wait [#allocation4], 128  }
   0xb   :  { %557 = vsyncadd [#allocation4], 4294967168 }
   0xc   :  { %558 = dma.done.wait [#allocation7], 2176  }
   0xd   :  { %559 = vsyncadd [#allocation7], 4294965120  ;;  %v82_v0 = vld [vmem:[#allocation8 + $0x78] sm:$0xff]  ;;  %v81_v1 = vld [vmem:[#allocation8 + $0x70] sm:$0xff]  ;;  %vm62_vm0 = vcmask 48128   ;;  %s451_s28 = sshll.u32 %s845_s3, 4  ;;  %s452_s28 = int_to_ptr.hbm [resolvable:$true] %s451_s28 }
   0xe   :  { %v80_v2 = vld [vmem:[#allocation8 + $0x68] sm:$0xff]  ;;  %v598_v3 = vand.u32 4294901760, %v82_v0  ;;  %v600_v4 = vand.u32 4294901760, %v81_v1  ;;  %v79_v6 = vld [vmem:[#allocation8 + $0x60] sm:$0xff]  ;;  %v78_v7 = vld [vmem:[#allocation8 + $0x58] sm:$0xff]  ;;  %s568_s4 = smov [#allocation9]  }
   0xf   :  { %v602_v5 = vand.u32 4294901760, %v80_v2  ;;  %v77_v8 = vld [vmem:[#allocation8 + $0x50] sm:$0xff]  ;;  %v604_v9 = vand.u32 4294901760, %v79_v6  ;;  %v606_v10 = vand.u32 4294901760, %v78_v7  ;;  %v76_v12 = vld [vmem:[#allocation8 + $0x48] sm:$0xff]  ;;  %v75_v13 = vld [vmem:[#allocation8 + $0x40] sm:$0xff] }
  0x10   :  { %v608_v11 = vand.u32 4294901760, %v77_v8  ;;  %84 = vmatpush.msra.mxu0 %v598_v3  ;;  %v612_v14 = vsub.f32 %v82_v0, %v598_v3  ;;  %v615_v15 = vsub.f32 %v81_v1, %v600_v4  ;;  %v620_v17 = vand.u32 4294901760, %v76_v12  ;;  %v74_v18 = vld [vmem:[#allocation8 + $0x38] sm:$0xff]  ;;  %280 = vmatpush.msra.mxu3 %v598_v3  ;;  %v73_v26 = vld [vmem:[#allocation8 + $0x30] sm:$0xff]  ;;  %v72_v36 = vld [vmem:[#allocation8 + $0x28] sm:$0xff] }
  0x11   :  { %v618_v16 = vsub.f32 %v80_v2, %v602_v5  ;;  %v624_v19 = vsub.f32 %v79_v6, %v604_v9  ;;  %v627_v20 = vsub.f32 %v78_v7, %v606_v10  ;;  %v636_v25 = vand.u32 4294901760, %v75_v13  ;;  %v71_v42 = vld [vmem:[#allocation8 + $0x20] sm:$0xff]  ;;  %v70_v47 = vld [vmem:[#allocation8 + $0x18] sm:$0xff]  ;;  %v69_v55 = vld [vmem:[#allocation8 + $0x10] sm:$0xff] }
  0x12   :  { %v630_v21 = vsub.f32 %v77_v8, %v608_v11  ;;  %86 = vmatpush.msra.mxu0 %v600_v4  ;;  %v126_v22 = vand.u32 4294901760, %v612_v14  ;;  %v132_v23 = vand.u32 4294901760, %v615_v15  ;;  %227 = vmatpush.msra.mxu2 %v612_v14  ;;  %v640_v28 = vand.u32 4294901760, %v74_v18  ;;  %v68_v60 = vld [vmem:[#allocation8 + $0x8] sm:$0xff]  ;;  %v64_v61 = vld [vmem:[#allocation3] sm:$0xff]  ;;  %v65_v62 = vld [vmem:[#allocation6] sm:$0xff] }
  0x13   :  { %v138_v24 = vand.u32 4294901760, %v618_v16  ;;  %v144_v27 = vand.u32 4294901760, %v624_v19  ;;  %v643_v29 = vsub.f32 %v76_v12, %v620_v17  ;;  %282 = vmatpush.msra.mxu3 %v600_v4  ;;  %v150_v33 = vand.u32 4294901760, %v627_v20  ;;  %v67_v6 = vld [vmem:[#allocation8] sm:$0xff] }
  0x14   :  { %88 = vmatpush.msra.mxu0 %v602_v5  ;;  %v127_v30 = vsub.f32 %v612_v14, %v126_v22  ;;  %v133_v31 = vsub.f32 %v615_v15, %v132_v23  ;;  %230 = vmatpush.msra.mxu2 %v615_v15  ;;  %v156_v34 = vand.u32 4294901760, %v630_v21  ;;  %v659_v35 = vand.u32 4294901760, %v73_v26 }
  0x15   :  { %v139_v32 = vsub.f32 %v618_v16, %v138_v24  ;;  %284 = vmatpush.msra.mxu3 %v602_v5  ;;  %v145_v39 = vsub.f32 %v624_v19, %v144_v27  ;;  %v667_v40 = vsub.f32 %v75_v13, %v636_v25  ;;  %v162_v41 = vand.u32 4294901760, %v643_v29 }
  0x16   :  { %v128_v37 = vand.u32 4294901760, %v127_v30  ;;  %90 = vmatpush.msra.mxu0 %v604_v9  ;;  %v134_v38 = vand.u32 4294901760, %v133_v31  ;;  %233 = vmatpush.msra.mxu2 %v618_v16  ;;  %v151_v44 = vsub.f32 %v627_v20, %v150_v33  ;;  %v676_v45 = vand.u32 4294901760, %v72_v36 }
  0x17   :  { %286 = vmatpush.msra.mxu3 %v604_v9  ;;  %v140_v43 = vand.u32 4294901760, %v139_v32  ;;  %v679_v46 = vsub.f32 %v74_v18, %v640_v28  ;;  %v168_v48 = vand.u32 4294901760, %v667_v40  ;;  %v146_v49 = vand.u32 4294901760, %v145_v39 }
  0x18   :  { %129 = vmatpush.msra.mxu1 %v128_v37  ;;  %92 = vmatpush.msra.mxu0 %v606_v10  ;;  %v157_v50 = vsub.f32 %v630_v21, %v156_v34  ;;  %v688_v51 = vand.u32 4294901760, %v71_v42  ;;  %v691_v52 = vsub.f32 %v73_v26, %v659_v35  ;;  %v163_v53 = vsub.f32 %v643_v29, %v162_v41 }
  0x19   :  { %236 = vmatpush.msra.mxu2 %v624_v19  ;;  %288 = vmatpush.msra.mxu3 %v606_v10  ;;  %v696_v54 = vand.u32 4294901760, %v70_v47  ;;  %v152_v56 = vand.u32 4294901760, %v151_v44  ;;  %v174_v57 = vand.u32 4294901760, %v679_v46  ;;  %v703_v58 = vsub.f32 %v72_v36, %v676_v45 }
  0x1a   :  { %135 = vmatpush.msra.mxu1 %v134_v38  ;;  %94 = vmatpush.msra.mxu0 %v608_v11  ;;  %v169_v59 = vsub.f32 %v667_v40, %v168_v48  ;;  %v158_v63 = vand.u32 4294901760, %v157_v50  ;;  %v180_v0 = vand.u32 4294901760, %v691_v52  ;;  %v712_v1 = vand.u32 4294901760, %v69_v55 }
  0x1b   :  { %239 = vmatpush.msra.mxu2 %v627_v20  ;;  %290 = vmatpush.msra.mxu3 %v608_v11  ;;  %v715_v2 = vsub.f32 %v71_v42, %v688_v51  ;;  %v164_v7 = vand.u32 4294901760, %v163_v53  ;;  %v718_v8 = vsub.f32 %v70_v47, %v696_v54  ;;  %v175_v12 = vsub.f32 %v679_v46, %v174_v57 }
  0x1c   :  { %141 = vmatpush.msra.mxu1 %v140_v43  ;;  %96 = vmatpush.msra.mxu0 %v620_v17  ;;  %v186_v13 = vand.u32 4294901760, %v703_v58  ;;  %v727_v18 = vand.u32 4294901760, %v68_v60  ;;  %v66_v26 = vsub.f32 %v64_v61, %v65_v62  ;;  %v170_v30 = vand.u32 4294901760, %v169_v59 }
  0x1d   :  { %242 = vmatpush.msra.mxu2 %v630_v21  ;;  %292 = vmatpush.msra.mxu3 %v620_v17  ;;  %v729_v31 = vand.u32 4294901760, %v67_v6  ;;  %v181_v32 = vsub.f32 %v691_v52, %v180_v0  ;;  %v192_v36 = vand.u32 4294901760, %v715_v2  ;;  %v739_v37 = vsub.f32 %v69_v55, %v712_v1 }
  0x1e   :  { %147 = vmatpush.msra.mxu1 %v146_v49  ;;  %98 = vmatpush.msra.mxu0 %v636_v25  ;;  %v741_v38 = vand.u32 4294901760, %v66_v26  ;;  %v198_v39 = vand.u32 4294901760, %v718_v8  ;;  %v176_v42 = vand.u32 4294901760, %v175_v12  ;;  %v187_v43 = vsub.f32 %v703_v58, %v186_v13 }
  0x1f   :  { %245 = vmatpush.msra.mxu2 %v643_v29  ;;  %294 = vmatpush.msra.mxu3 %v636_v25  ;;  %v751_v44 = vsub.f32 %v68_v60, %v727_v18  ;;  %v182_v49 = vand.u32 4294901760, %v181_v32  ;;  %v193_v50 = vsub.f32 %v715_v2, %v192_v36  ;;  %v204_v53 = vand.u32 4294901760, %v739_v37 }
  0x20   :  { %153 = vmatpush.msra.mxu1 %v152_v56  ;;  %100 = vmatpush.msra.mxu0 %v640_v28  ;;  %v116_v47 = vsub.f32 %v66_v26, %v741_v38  ;;  %v762_v55 = vsub.f32 %v67_v6, %v729_v31  ;;  %v188_v56 = vand.u32 4294901760, %v187_v43  ;;  %v199_v59 = vsub.f32 %v718_v8, %v198_v39 }
  0x21   :  { %248 = vmatpush.msra.mxu2 %v667_v40  ;;  %296 = vmatpush.msra.mxu3 %v640_v28  ;;  %v210_v60 = vand.u32 4294901760, %v751_v44  ;;  %v194_v62 = vand.u32 4294901760, %v193_v50 }
  0x22   :  { %159 = vmatpush.msra.mxu1 %v158_v63  ;;  %102 = vmatpush.msra.mxu0 %v659_v35  ;;  %v117_v61 = vand.u32 4294901760, %v116_v47  ;;  %v205_v63 = vsub.f32 %v739_v37, %v204_v53  ;;  %v216_v6 = vand.u32 4294901760, %v762_v55 }
  0x23   :  { %251 = vmatpush.msra.mxu2 %v679_v46  ;;  %298 = vmatpush.msra.mxu3 %v659_v35  ;;  %v211_v12 = vsub.f32 %v751_v44, %v210_v60 }
  0x24   :  { %165 = vmatpush.msra.mxu1 %v164_v7  ;;  %104 = vmatpush.msra.mxu0 %v676_v45  ;;  %v200_v7 = vand.u32 4294901760, %v199_v59  ;;  %v118_v26 = vsub.f32 %v116_v47, %v117_v61  ;;  %v217_v32 = vsub.f32 %v762_v55, %v216_v6 }
  0x25   :  { %254 = vmatpush.msra.mxu2 %v691_v52  ;;  %300 = vmatpush.msra.mxu3 %v676_v45 }
  0x26   :  { %171 = vmatpush.msra.mxu1 %v170_v30  ;;  %106 = vmatpush.msra.mxu0 %v688_v51  ;;  %v206_v30 = vand.u32 4294901760, %v205_v63  ;;  %v119_v43 = vand.u32 4294901760, %v118_v26 }
  0x27   :  { %257 = vmatpush.msra.mxu2 %v703_v58  ;;  %302 = vmatpush.msra.mxu3 %v688_v51 }
  0x28   :  { %177 = vmatpush.msra.mxu1 %v176_v42  ;;  %108 = vmatpush.msra.mxu0 %v696_v54  ;;  %v212_v42 = vand.u32 4294901760, %v211_v12 }
  0x29   :  { %260 = vmatpush.msra.mxu2 %v715_v2  ;;  %304 = vmatpush.msra.mxu3 %v696_v54 }
  0x2a   :  { %183 = vmatpush.msra.mxu1 %v182_v49  ;;  %110 = vmatpush.msra.mxu0 %v712_v1  ;;  %v218_v49 = vand.u32 4294901760, %v217_v32 }
  0x2b   :  { %263 = vmatpush.msra.mxu2 %v718_v8  ;;  %306 = vmatpush.msra.mxu3 %v712_v1 }
  0x2c   :  { %189 = vmatpush.msra.mxu1 %v188_v56  ;;  %112 = vmatpush.msra.mxu0 %v727_v18 }
  0x2d   :  { %266 = vmatpush.msra.mxu2 %v739_v37  ;;  %308 = vmatpush.msra.mxu3 %v727_v18 }
  0x2e   :  { %195 = vmatpush.msra.mxu1 %v194_v62  ;;  %114 = vmatpush.msra.mxu0 %v729_v31 }
  0x2f   :  { %269 = vmatpush.msra.mxu2 %v751_v44  ;;  %310 = vmatpush.msra.mxu3 %v729_v31 }
  0x30   :  { %321 = vmatpush.msrb.mxu0 %v126_v22  ;;  %201 = vmatpush.msra.mxu1 %v200_v7 }
  0x31   :  { %272 = vmatpush.msra.mxu2 %v762_v55  ;;  %314 = vmatmul.f32.vlgmr.msra.gmra.mxu3 %v117_v61 }
  0x32   :  { %325 = vmatpush.msrb.mxu0 %v132_v23  ;;  %207 = vmatpush.msra.mxu1 %v206_v30 }
  0x33   :  { %275 = vmatmul.f32.vlgmr.msra.gmra.mxu2 %v116_v47  ;;  %120 = vmatmul.f32.vlgmr.msra.gmra.mxu0 %v119_v43 }
  0x34   :  { %329 = vmatpush.msrb.mxu0 %v138_v24  ;;  %213 = vmatpush.msra.mxu1 %v212_v42 }
  0x36   :  { %333 = vmatpush.msrb.mxu0 %v144_v27  ;;  %219 = vmatpush.msra.mxu1 %v218_v49 }
  0x37   :  { %221 = vmatmul.f32.vlgmr.msra.gmra.mxu1 %v741_v38 }
  0x38   :  { %388 = vmatpush.msrb.mxu1 %v598_v3  ;;  %337 = vmatpush.msrb.mxu0 %v150_v33  ;;  %v567_v3 = vmov 0.0  }
  0x39   :  { %63 = vst.msk [vmem:[#allocation2] sm:$0xff] %vm62_vm0, %v567_v3 }
  0x3a   :  { %390 = vmatpush.msrb.mxu1 %v600_v4  ;;  %341 = vmatpush.msrb.mxu0 %v156_v34 }
  0x3c   :  { %392 = vmatpush.msrb.mxu1 %v602_v5  ;;  %345 = vmatpush.msrb.mxu0 %v162_v41 }
  0x3e   :  { %394 = vmatpush.msrb.mxu1 %v604_v9  ;;  %349 = vmatpush.msrb.mxu0 %v168_v48 }
  0x40   :  { %396 = vmatpush.msrb.mxu1 %v606_v10  ;;  %353 = vmatpush.msrb.mxu0 %v174_v57  ;;  %v424_v21 = vld [vmem:[#allocation2] sm:$0xff] }
  0x42   :  { %398 = vmatpush.msrb.mxu1 %v608_v11  ;;  %357 = vmatpush.msrb.mxu0 %v180_v0 }
  0x44   :  { %400 = vmatpush.msrb.mxu1 %v620_v17  ;;  %361 = vmatpush.msrb.mxu0 %v186_v13 }
  0x46   :  { %402 = vmatpush.msrb.mxu1 %v636_v25  ;;  %365 = vmatpush.msrb.mxu0 %v192_v36 }
  0x48   :  { %404 = vmatpush.msrb.mxu1 %v640_v28  ;;  %369 = vmatpush.msrb.mxu0 %v198_v39 }
  0x4a   :  { %406 = vmatpush.msrb.mxu1 %v659_v35  ;;  %373 = vmatpush.msrb.mxu0 %v204_v53 }
  0x4c   :  { %408 = vmatpush.msrb.mxu1 %v676_v45  ;;  %377 = vmatpush.msrb.mxu0 %v210_v60 }
  0x4e   :  { %410 = vmatpush.msrb.mxu1 %v688_v51  ;;  %381 = vmatpush.msrb.mxu0 %v216_v6 }
  0x4f   :  { %383 = vmatmul.f32.vlgmr.msrb.gmra.mxu0 %v741_v38 }
  0x50   :  { %412 = vmatpush.msrb.mxu1 %v696_v54 }
  0x52   :  { %414 = vmatpush.msrb.mxu1 %v712_v1 }
  0x54   :  { %416 = vmatpush.msrb.mxu1 %v727_v18 }
  0x56   :  { %418 = vmatpush.msrb.mxu1 %v729_v31 }
  0x57   :  { %420 = vmatmul.f32.vlgmr.msrb.gmra.mxu1 %v741_v38 }
  0xb0   :  { %v121_v5 = vpop.f32.mrf.mxu0 }
  0xb4   :  { %v222_v4 = vpop.f32.mrf.mxu1  ;;  %v315_v14 = vpop.f32.mrf.mxu3 }
  0xb5   :  { %v223_v9 = vadd.f32 %v222_v4, %v121_v5 }
  0xb6   :  { %v276_v10 = vpop.f32.mrf.mxu2 }
  0xb7   :  { %v277_v11 = vadd.f32 %v276_v10, %v223_v9 }
  0xb9   :  { %v316_v15 = vadd.f32 %v315_v14, %v277_v11 }
  0xcc   :  { %v384_v16 = vpop.f32.mrf.mxu0 }
  0xcd   :  { %v385_v17 = vadd.f32 %v384_v16, %v316_v15 }
  0xd4   :  { %v421_v19 = vpop.f32.mrf.mxu1 }
  0xd5   :  { %v422_v20 = vadd.f32 %v421_v19, %v385_v17 }
  0xd7   :  { %v425_v22 = vand.u32 2147483647, %v422_v20 }
  0xd9   :  { %v426_v23 = vadd.f32 %v425_v22, %v424_v21 }
  0xdb   :  { %428 = vst.msk [vmem:[#allocation2] sm:$0xff] %vm62_vm0, %v426_v23 }
  0xe2   :  { %v432_v24 = vld [vmem:[#allocation2] sm:$0xff] }
  0xe3   :  { %v433_v25 = vsel %vm62_vm0, %v432_v24, 0.0 }
  0xe4   :  { %434 = vadd.xlane.f32.xlu0 %v433_v25 }
 0x157   :  { %v435_v27 = vpop.xlane.xlu0 %434 }
 0x158   :  { %v436_v28 = vrot.slane %v435_v27, 4 }
 0x15a   :  { %v437_v29 = vadd.f32 %v436_v28, %v435_v27 }
 0x15c   :  { %v438_v33 = vrot.slane %v437_v29, 2 }
 0x15e   :  { %v439_v34 = vadd.f32 %v438_v33, %v437_v29 }
 0x160   :  { %v440_v35 = vrot.slane %v439_v34, 1 }
 0x162   :  { %v441_v40 = vadd.f32 %v440_v35, %v439_v34 }
 0x164   :  { %463 = vpush %v441_v40 }
 0x195   :  { %s464_s29 = spop %463 }
 0x196   :  { %s443_s30 = smul.f32 0.020833334, %s464_s29 }
 0x198   :  { %445 = sst [smem:[#allocation9]] %s443_s30 }
 0x199   :  { %454 = dma.smem_to_hbm %s568_s4, 16, %s452_s28, [#allocation5]  }
 0x19a   :  { %560 = dma.done.wait [#allocation5], 16  }
 0x19b   :  { %561 = vsyncadd [#allocation5], 4294967280 }
 0x19c   :  { %459 = sfence }
 0x19d   :  { %460 = vsyncpa [#allocation4], 1 }
 0x19e   :  { %461 = vsyncpa [#allocation7], 1 }
 0x19f   :  { %462 = vsyncpa [#allocation5], 1 }

</bundles_post_ra>
